<compile_context>
chip_gen: v7x
topology: tpu7x:2x2x1
jax: 0.10.0
libtpu: 0.0.40
codegen_flags: <defaults>
</compile_context>

<pallas_src>
import math
import functools

import jax
import jax.numpy as jnp
from jax.experimental import pallas as pl
from jax.experimental.pallas import tpu as pltpu


# ----------------------------------------------------------------------------
# Fused kernel: grid = (batch_blocks, nlayers)
# ----------------------------------------------------------------------------
def fused_transformer_kernel(nhead,
                             x_ref, mask_ref,
                             wqkv_ref, bqkv_ref, wo_ref, bo_ref,
                             w1_ref, b1_ref, w2_ref, b2_ref,
                             ln1w_ref, ln1b_ref, ln2w_ref, ln2b_ref,
                             dec_w_ref, dec_b_ref,
                             o_ref,
                             x_scr, head_scr):
    """One grid step = one nn.TransformerEncoderLayer (post-norm, ReLU, eval mode)
    applied to one batch block.  Activation is resident in `x_scr` across the
    layer axis; the decoder Linear(E->2)+softmax is fused into the last layer."""
    l = pl.program_id(1)
    n_layers = pl.num_programs(1)

    NB, S, E = x_ref.shape
    H = nhead
    hd = E // H
    R = NB * S
    scale = 1.0 / math.sqrt(hd)

    # Load the embedded input into the resident activation at the first layer.
    @pl.when(l == 0)
    def _():
        x_scr[...] = x_ref[...].reshape(R, E)

    x2 = x_scr[...]                                            # (R, E) f32

    # ---- multi-head self-attention -----------------------------------------
    # QKV projection (weight pre-transposed to (E, 3E)); bf16 MXU, f32 accumulate.
    qkv = jnp.dot(x2.astype(jnp.bfloat16), wqkv_ref[...],
                  preferred_element_type=jnp.float32) + bqkv_ref[...]   # (R, 3E) f32

    q3 = (qkv[:, 0 * E:1 * E] * scale).reshape(NB, S, E)       # scale folded into q
    k3 = qkv[:, 1 * E:2 * E].reshape(NB, S, E)
    v3 = qkv[:, 2 * E:3 * E].reshape(NB, S, E)

    # Batch all heads into single einsums: (H*NB, S, hd)
    q_b = jnp.concatenate([q3[:, :, h * hd:(h + 1) * hd] for h in range(H)], axis=0)
    k_b = jnp.concatenate([k3[:, :, h * hd:(h + 1) * hd] for h in range(H)], axis=0)
    v_b = jnp.concatenate([v3[:, :, h * hd:(h + 1) * hd] for h in range(H)], axis=0)

    # Additive mask; clamp -inf to a large finite negative for NaN robustness.
    mask = jnp.maximum(mask_ref[...], -1e30)[None, :, :]       # (1, S, S)

    s = jnp.einsum('bqd,bkd->bqk',
                   q_b.astype(jnp.bfloat16), k_b.astype(jnp.bfloat16),
                   preferred_element_type=jnp.float32)         # (H*NB, S, S) f32
    s = s + mask
    m = jnp.max(s, axis=-1, keepdims=True)
    p = jnp.exp(s - m)
    p = p * pl.reciprocal(jnp.sum(p, axis=-1, keepdims=True), approx=True)

    ah = jnp.einsum('bqk,bkd->bqd',
                    p.astype(jnp.bfloat16), v_b.astype(jnp.bfloat16),
                    preferred_element_type=jnp.float32)        # (H*NB, S, hd)

    # Re-assemble heads on the lane axis, then ONE (R,E) @ (E,E) output projection.
    for h in range(H):
        head_scr[:, h * hd:(h + 1) * hd] = ah[h * NB:(h + 1) * NB].reshape(R, hd)
    attn = jnp.dot(head_scr[...].astype(jnp.bfloat16), wo_ref[...],
                   preferred_element_type=jnp.float32) + bo_ref[...]    # (R, E)

    def layer_norm(t, w, b):
        mu = jnp.mean(t, axis=-1, keepdims=True)
        var = jnp.mean(t * t, axis=-1, keepdims=True) - mu * mu     # single pass
        return (t - mu) * jax.lax.rsqrt(var + 1e-5) * w + b

    # residual + norm1
    y = layer_norm(x2 + attn, ln1w_ref[...], ln1b_ref[...])          # (R, E) f32

    # ---- feed-forward --------------------------------------------------------
    h1 = jnp.dot(y.astype(jnp.bfloat16), w1_ref[...],
                 preferred_element_type=jnp.float32) + b1_ref[...]
    h1 = jnp.maximum(h1, 0.0)                                        # ReLU
    z = jnp.dot(h1.astype(jnp.bfloat16), w2_ref[...],
                preferred_element_type=jnp.float32) + b2_ref[...]

    # residual + norm2; write back to the resident activation
    out = layer_norm(y + z, ln2w_ref[...], ln2b_ref[...])            # (R, E)
    x_scr[...] = out

    # ---- decoder Linear(E->2) + softmax, fused at the last layer -------------
    @pl.when(l == n_layers - 1)
    def _():
        logits = jnp.dot(out.astype(jnp.bfloat16), dec_w_ref[...],
                         preferred_element_type=jnp.float32) + dec_b_ref[...]  # (R, 2)
        mm = jnp.max(logits, axis=-1, keepdims=True)
        e = jnp.exp(logits - mm)
        probs = e / jnp.sum(e, axis=-1, keepdims=True)
        o_ref[...] = probs.reshape(NB, S, 2)


# ----------------------------------------------------------------------------
# Wrapper (single pallas_call over the whole stack)
# ----------------------------------------------------------------------------
def transformer_pallas(params, x_nse, src_mask, *, nhead, batch_block=1):
    N, S, E = x_nse.shape
    L = params['wqkv_t'].shape[0]
    nhid = params['w1_t'].shape[2]
    NB = batch_block
    assert N % NB == 0, (N, NB)

    def lspec(*trail):           # per-layer stacked weight, leading layer dim squeezed
        nd = len(trail)
        return pl.BlockSpec((None,) + tuple(trail),
                            lambda b, l, _nd=nd: (l,) + (0,) * _nd)

    def cspec(*shape):           # constant (layer/batch independent) operand
        nd = len(shape)
        return pl.BlockSpec(tuple(shape), lambda b, l, _nd=nd: (0,) * _nd)

    in_specs = [
        pl.BlockSpec((NB, S, E), lambda b, l: (b, 0, 0)),    # x (fetched once per batch block)
        cspec(S, S),                                         # additive attention mask
        lspec(E, 3 * E),                                     # wqkv^T (bf16)
        lspec(1, 3 * E),                                     # bqkv
        lspec(E, E),                                         # wo^T (bf16)
        lspec(1, E),                                         # bo
        lspec(E, nhid),                                      # w1^T (bf16)
        lspec(1, nhid),                                      # b1
        lspec(nhid, E),                                      # w2^T (bf16)
        lspec(1, E),                                         # b2
        lspec(1, E), lspec(1, E),                            # ln1 w/b
        lspec(1, E), lspec(1, E),                            # ln2 w/b
        cspec(E, 2),                                         # decoder W^T (bf16)
        cspec(1, 2),                                         # decoder bias
    ]
    out_spec = pl.BlockSpec((NB, S, 2), lambda b, l: (b, 0, 0))

    kernel = functools.partial(fused_transformer_kernel, nhead)

    return pl.pallas_call(
        kernel,
        out_shape=jax.ShapeDtypeStruct((N, S, 2), jnp.float32),
        grid=(N // NB, L),
        in_specs=in_specs,
        out_specs=out_spec,
        scratch_shapes=[pltpu.VMEM((NB * S, E), jnp.float32),   # resident activation
                        pltpu.VMEM((NB * S, E), jnp.float32)],  # head re-assembly buffer
        compiler_params=pltpu.CompilerParams(
            dimension_semantics=("parallel", "arbitrary"),
            vmem_limit_bytes=32 * 1024 * 1024),
    )(x_nse, src_mask,
      params['wqkv_t'], params['bqkv'], params['wo_t'], params['bo'],
      params['w1_t'], params['b1'], params['w2_t'], params['b2'],
      params['ln1w'], params['ln1b'], params['ln2w'], params['ln2b'],
      params['dec_w_t'], params['dec_b'])


# ----------------------------------------------------------------------------
# Glue: embedding, positional encoding, full forward
# ----------------------------------------------------------------------------
def positional_encoding(max_len, d_model):
    position = jnp.arange(max_len, dtype=jnp.float32)[:, None]
    div_term = jnp.exp(jnp.arange(0, d_model, 2, dtype=jnp.float32)
                       * (-math.log(10000.0) / d_model))
    pe = jnp.zeros((max_len, d_model), dtype=jnp.float32)
    pe = pe.at[:, 0::2].set(jnp.sin(position * div_term))
    pe = pe.at[:, 1::2].set(jnp.cos(position * div_term))
    return pe                                            # (max_len, d_model)


def generate_square_subsequent_mask(sz):
    idx = jnp.arange(sz)
    allowed = idx[None, :] <= idx[:, None]
    return jnp.where(allowed, 0.0, -jnp.inf).astype(jnp.float32)


def transformer_forward(params, src, src_mask, *, nhead, batch_block=1):
    # src: (S, N) int32 token ids (PyTorch batch_first=False)
    S, N = src.shape
    E = params['embedding'].shape[1]

    x = params['embedding'][src] * math.sqrt(E)          # Embedding * sqrt(ninp), (S,N,E)
    pe = positional_encoding(S, E)
    x = x + pe[:, None, :]                               # PositionalEncoding (dropout = id)

    x = jnp.transpose(x, (1, 0, 2)).astype(jnp.float32)  # -> (N, S, E) kernel layout
    out = transformer_pallas(params, x, src_mask, nhead=nhead, batch_block=batch_block)
    return jnp.transpose(out, (1, 0, 2))                 # -> (S, N, 2), matches PyTorch


# ----------------------------------------------------------------------------
# Deterministic parameter init (shapes follow the PyTorch module __init__);
# linear weights are stored pre-transposed (y = x @ W^T + b) and in bf16,
# stacked over the layer axis for the fused kernel.
# ----------------------------------------------------------------------------
def init_params(key, ntoken, ninp, nhead, nhid, nlayers):
    initrange = 0.1
    s_in = 1.0 / math.sqrt(ninp)
    s_hid = 1.0 / math.sqrt(nhid)
    keys = jax.random.split(key, 8)
    u = jax.random.uniform
    return {
        'embedding': u(keys[0], (ntoken, ninp), jnp.float32, -initrange, initrange),
        'dec_w_t': u(keys[1], (ninp, 2), jnp.float32, -initrange, initrange).astype(jnp.bfloat16),
        'dec_b': jnp.zeros((1, 2), jnp.float32),
        'wqkv_t': u(keys[2], (nlayers, ninp, 3 * ninp), jnp.float32, -s_in, s_in).astype(jnp.bfloat16),
        'bqkv': jnp.zeros((nlayers, 1, 3 * ninp), jnp.float32),
        'wo_t': u(keys[3], (nlayers, ninp, ninp), jnp.float32, -s_in, s_in).astype(jnp.bfloat16),
        'bo': jnp.zeros((nlayers, 1, ninp), jnp.float32),
        'w1_t': u(keys[4], (nlayers, ninp, nhid), jnp.float32, -s_in, s_in).astype(jnp.bfloat16),
        'b1': u(keys[5], (nlayers, 1, nhid), jnp.float32, -s_in, s_in),
        'w2_t': u(keys[6], (nlayers, nhid, ninp), jnp.float32, -s_hid, s_hid).astype(jnp.bfloat16),
        'b2': u(keys[7], (nlayers, 1, ninp), jnp.float32, -s_hid, s_hid),
        'ln1w': jnp.ones((nlayers, 1, ninp), jnp.float32),
        'ln1b': jnp.zeros((nlayers, 1, ninp), jnp.float32),
        'ln2w': jnp.ones((nlayers, 1, ninp), jnp.float32),
        'ln2b': jnp.zeros((nlayers, 1, ninp), jnp.float32),
    }


# ----------------------------------------------------------------------------
if __name__ == "__main__":
    # TransformerModel(ntoken=50, ninp=32, nhead=4, nhid=64, nlayers=2)
    ntoken, ninp, nhead, nhid, nlayers = 50, 32, 4, 64, 2
    S, N = 8, 2                                          # seq_len, batch

    key = jax.random.PRNGKey(0)
    pkey, skey = jax.random.split(key)

    params = init_params(pkey, ntoken, ninp, nhead, nhid, nlayers)
    src = jax.random.randint(skey, (S, N), 0, ntoken, dtype=jnp.int32)
    src_mask = generate_square_subsequent_mask(S)

    fwd = jax.jit(functools.partial(transformer_forward, nhead=nhead, batch_block=1))
    out = fwd(params, src, src_mask)
    jax.block_until_ready(out)

    assert out.shape == (S, N, 2), out.shape
    assert bool(jnp.all(jnp.isfinite(out)))
    # softmax rows must sum to 1
    assert bool(jnp.allclose(jnp.sum(out, axis=2), 1.0, atol=1e-4))
    print("KERNEL_OK")
</pallas_src>

<mosaic_0001>
module attributes {stable_mosaic.version = 11 : i64} {
  func.func @fused_transformer_kernel(%arg0: i32, %arg1: i32, %arg2: memref<1x8x32xf32, #tpu.memory_space<vmem>>, %arg3: memref<8x8xf32, #tpu.memory_space<vmem>>, %arg4: memref<1x32x96xbf16, #tpu.memory_space<vmem>>, %arg5: memref<1x1x96xf32, #tpu.memory_space<vmem>>, %arg6: memref<1x32x32xbf16, #tpu.memory_space<vmem>>, %arg7: memref<1x1x32xf32, #tpu.memory_space<vmem>>, %arg8: memref<1x32x64xbf16, #tpu.memory_space<vmem>>, %arg9: memref<1x1x64xf32, #tpu.memory_space<vmem>>, %arg10: memref<1x64x32xbf16, #tpu.memory_space<vmem>>, %arg11: memref<1x1x32xf32, #tpu.memory_space<vmem>>, %arg12: memref<1x1x32xf32, #tpu.memory_space<vmem>>, %arg13: memref<1x1x32xf32, #tpu.memory_space<vmem>>, %arg14: memref<1x1x32xf32, #tpu.memory_space<vmem>>, %arg15: memref<1x1x32xf32, #tpu.memory_space<vmem>>, %arg16: memref<32x2xbf16, #tpu.memory_space<vmem>>, %arg17: memref<1x2xf32, #tpu.memory_space<vmem>>, %arg18: memref<1x8x2xf32, #tpu.memory_space<vmem>>, %arg19: memref<8x32xf32, #tpu.memory_space<vmem>>, %arg20: memref<8x32xf32, #tpu.memory_space<vmem>>) attributes {dimension_semantics = [#tpu.dimension_semantics<parallel>, #tpu.dimension_semantics<arbitrary>], iteration_bounds = array<i64: 2, 2>, scalar_prefetch = 0 : i64, scratch_operands = 2 : i64, tpu.core_type = #tpu.core_type<tc>, window_params = [{transform_indices = @transform_0, window_bounds = array<i64: 1, 8, 32>}, {pipeline_mode = #tpu.pipeline_mode<synchronous>, transform_indices = @transform_1, window_bounds = array<i64: 8, 8>}, {transform_indices = @transform_2, window_bounds = array<i64: 1, 32, 96>}, {transform_indices = @transform_3, window_bounds = array<i64: 1, 1, 96>}, {transform_indices = @transform_4, window_bounds = array<i64: 1, 32, 32>}, {transform_indices = @transform_5, window_bounds = array<i64: 1, 1, 32>}, {transform_indices = @transform_6, window_bounds = array<i64: 1, 32, 64>}, {transform_indices = @transform_7, window_bounds = array<i64: 1, 1, 64>}, {transform_indices = @transform_8, window_bounds = array<i64: 1, 64, 32>}, {transform_indices = @transform_9, window_bounds = array<i64: 1, 1, 32>}, {transform_indices = @transform_10, window_bounds = array<i64: 1, 1, 32>}, {transform_indices = @transform_11, window_bounds = array<i64: 1, 1, 32>}, {transform_indices = @transform_12, window_bounds = array<i64: 1, 1, 32>}, {transform_indices = @transform_13, window_bounds = array<i64: 1, 1, 32>}, {pipeline_mode = #tpu.pipeline_mode<synchronous>, transform_indices = @transform_14, window_bounds = array<i64: 32, 2>}, {pipeline_mode = #tpu.pipeline_mode<synchronous>, transform_indices = @transform_15, window_bounds = array<i64: 1, 2>}, {transform_indices = @transform_16, window_bounds = array<i64: 1, 8, 2>}]} {
    %c0_i32 = arith.constant 0 : i32
    %0 = arith.cmpi eq, %arg1, %c0_i32 : i32
    %1 = arith.extui %0 : i1 to i32
    %c0_i32_0 = arith.constant 0 : i32
    %2 = arith.cmpi ne, %1, %c0_i32_0 : i32
    scf.if %2 {
      %c0_70 = arith.constant 0 : index
      %c0_71 = arith.constant 0 : index
      %c0_72 = arith.constant 0 : index
      %154 = vector.load %arg2[%c0_70, %c0_71, %c0_72] : memref<1x8x32xf32, #tpu.memory_space<vmem>>, vector<1x8x32xf32>
      %155 = vector.shape_cast %154 : vector<1x8x32xf32> to vector<8x32xf32>
      %c0_73 = arith.constant 0 : index
      %c0_74 = arith.constant 0 : index
      %156 = vector.load %arg19[%c0_73, %c0_74] : memref<8x32xf32, #tpu.memory_space<vmem>>, vector<8x32xf32>
      tpu.vector_store %arg19[%c0_73, %c0_74], %155 {strides = array<i32>} : memref<8x32xf32, #tpu.memory_space<vmem>>, vector<8x32xf32>,
    } else {
    }
    %c0 = arith.constant 0 : index
    %c0_1 = arith.constant 0 : index
    %3 = vector.load %arg19[%c0, %c0_1] : memref<8x32xf32, #tpu.memory_space<vmem>>, vector<8x32xf32>
    %4 = arith.truncf %3 : vector<8x32xf32> to vector<8x32xbf16>
    %c0_2 = arith.constant 0 : index
    %c0_3 = arith.constant 0 : index
    %c0_4 = arith.constant 0 : index
    %5 = vector.load %arg4[%c0_2, %c0_3, %c0_4] : memref<1x32x96xbf16, #tpu.memory_space<vmem>>, vector<1x32x96xbf16>
    %6 = vector.shape_cast %5 : vector<1x32x96xbf16> to vector<32x96xbf16>
    %cst = arith.constant dense<0.000000e+00> : vector<8x96xf32>
    %7 = tpu.matmul %4, %6, %cst {dimension_numbers = #tpu.dot_dimension_numbers<[1], [0], [0], [1], [0, 0, 1, 1], [], []>} : vector<8x32xbf16>, vector<32x96xbf16>, vector<8x96xf32> -> vector<8x96xf32>
    %c0_5 = arith.constant 0 : index
    %c0_6 = arith.constant 0 : index
    %c0_7 = arith.constant 0 : index
    %8 = vector.load %arg5[%c0_5, %c0_6, %c0_7] : memref<1x1x96xf32, #tpu.memory_space<vmem>>, vector<1x1x96xf32>
    %9 = vector.shape_cast %8 : vector<1x1x96xf32> to vector<1x96xf32>
    %10 = vector.broadcast %9 : vector<1x96xf32> to vector<8x96xf32>
    %11 = arith.addf %7, %10 : vector<8x96xf32>
    %12 = vector.extract_strided_slice %11 {offsets = [0, 0], sizes = [8, 32], strides = [1, 1]} : vector<8x96xf32> to vector<8x32xf32>
    %cst_8 = arith.constant 0.353553385 : f32
    %13 = vector.broadcast %cst_8 : f32 to vector<8x32xf32>
    %14 = arith.mulf %12, %13 : vector<8x32xf32>
    %15 = vector.shape_cast %14 : vector<8x32xf32> to vector<1x8x32xf32>
    %16 = vector.extract_strided_slice %11 {offsets = [0, 32], sizes = [8, 32], strides = [1, 1]} : vector<8x96xf32> to vector<8x32xf32>
    %17 = vector.shape_cast %16 : vector<8x32xf32> to vector<1x8x32xf32>
    %18 = vector.extract_strided_slice %11 {offsets = [0, 64], sizes = [8, 32], strides = [1, 1]} : vector<8x96xf32> to vector<8x32xf32>
    %19 = vector.shape_cast %18 : vector<8x32xf32> to vector<1x8x32xf32>
    %20 = vector.extract_strided_slice %15 {offsets = [0, 0, 0], sizes = [1, 8, 8], strides = [1, 1, 1]} : vector<1x8x32xf32> to vector<1x8x8xf32>
    %21 = vector.extract_strided_slice %15 {offsets = [0, 0, 8], sizes = [1, 8, 8], strides = [1, 1, 1]} : vector<1x8x32xf32> to vector<1x8x8xf32>
    %22 = vector.extract_strided_slice %15 {offsets = [0, 0, 16], sizes = [1, 8, 8], strides = [1, 1, 1]} : vector<1x8x32xf32> to vector<1x8x8xf32>
    %23 = vector.extract_strided_slice %15 {offsets = [0, 0, 24], sizes = [1, 8, 8], strides = [1, 1, 1]} : vector<1x8x32xf32> to vector<1x8x8xf32>
    %24 = tpu.concatenate %20, %21, %22, %23 in 0 : vector<1x8x8xf32>, vector<1x8x8xf32>, vector<1x8x8xf32>, vector<1x8x8xf32> -> vector<4x8x8xf32>
    %25 = vector.extract_strided_slice %17 {offsets = [0, 0, 0], sizes = [1, 8, 8], strides = [1, 1, 1]} : vector<1x8x32xf32> to vector<1x8x8xf32>
    %26 = vector.extract_strided_slice %17 {offsets = [0, 0, 8], sizes = [1, 8, 8], strides = [1, 1, 1]} : vector<1x8x32xf32> to vector<1x8x8xf32>
    %27 = vector.extract_strided_slice %17 {offsets = [0, 0, 16], sizes = [1, 8, 8], strides = [1, 1, 1]} : vector<1x8x32xf32> to vector<1x8x8xf32>
    %28 = vector.extract_strided_slice %17 {offsets = [0, 0, 24], sizes = [1, 8, 8], strides = [1, 1, 1]} : vector<1x8x32xf32> to vector<1x8x8xf32>
    %29 = tpu.concatenate %25, %26, %27, %28 in 0 : vector<1x8x8xf32>, vector<1x8x8xf32>, vector<1x8x8xf32>, vector<1x8x8xf32> -> vector<4x8x8xf32>
    %30 = vector.extract_strided_slice %19 {offsets = [0, 0, 0], sizes = [1, 8, 8], strides = [1, 1, 1]} : vector<1x8x32xf32> to vector<1x8x8xf32>
    %31 = vector.extract_strided_slice %19 {offsets = [0, 0, 8], sizes = [1, 8, 8], strides = [1, 1, 1]} : vector<1x8x32xf32> to vector<1x8x8xf32>
    %32 = vector.extract_strided_slice %19 {offsets = [0, 0, 16], sizes = [1, 8, 8], strides = [1, 1, 1]} : vector<1x8x32xf32> to vector<1x8x8xf32>
    %33 = vector.extract_strided_slice %19 {offsets = [0, 0, 24], sizes = [1, 8, 8], strides = [1, 1, 1]} : vector<1x8x32xf32> to vector<1x8x8xf32>
    %34 = tpu.concatenate %30, %31, %32, %33 in 0 : vector<1x8x8xf32>, vector<1x8x8xf32>, vector<1x8x8xf32>, vector<1x8x8xf32> -> vector<4x8x8xf32>
    %c0_9 = arith.constant 0 : index
    %c0_10 = arith.constant 0 : index
    %35 = vector.load %arg3[%c0_9, %c0_10] : memref<8x8xf32, #tpu.memory_space<vmem>>, vector<8x8xf32>
    %cst_11 = arith.constant -1.000000e+30 : f32
    %36 = vector.broadcast %cst_11 : f32 to vector<8x8xf32>
    %37 = arith.maximumf %35, %36 : vector<8x8xf32>
    %38 = vector.shape_cast %37 : vector<8x8xf32> to vector<1x8x8xf32>
    %39 = arith.truncf %24 : vector<4x8x8xf32> to vector<4x8x8xbf16>
    %40 = arith.truncf %29 : vector<4x8x8xf32> to vector<4x8x8xbf16>
    "tpu.trace_start"() <{level = 10 : i32, message = "bqd,bkd->bqk"}> : () -> ()
    %cst_12 = arith.constant dense<0.000000e+00> : vector<4x8x8xf32>
    %41 = tpu.matmul %39, %40, %cst_12 {dimension_numbers = #tpu.dot_dimension_numbers<[2], [2], [1], [1], [0, 0, 0, 1, 1, 1], [0], [0]>} : vector<4x8x8xbf16>, vector<4x8x8xbf16>, vector<4x8x8xf32> -> vector<4x8x8xf32>
    "tpu.trace_stop"() : () -> ()
    %42 = vector.broadcast %38 : vector<1x8x8xf32> to vector<4x8x8xf32>
    %43 = arith.addf %41, %42 : vector<4x8x8xf32>
    %cst_13 = arith.constant dense<0xFF800000> : vector<4x8xf32>
    %44 = vector.multi_reduction <maximumf>, %43, %cst_13 [2] : vector<4x8x8xf32> to vector<4x8xf32>
    %45 = vector.shape_cast %44 : vector<4x8xf32> to vector<4x8x1xf32>
    %46 = vector.broadcast %45 : vector<4x8x1xf32> to vector<4x8x8xf32>
    %47 = arith.subf %43, %46 : vector<4x8x8xf32>
    %48 = math.exp %47 : vector<4x8x8xf32>
    %cst_14 = arith.constant dense<0.000000e+00> : vector<4x8xf32>
    %49 = vector.multi_reduction <add>, %48, %cst_14 [2] : vector<4x8x8xf32> to vector<4x8xf32>
    %50 = vector.shape_cast %49 : vector<4x8xf32> to vector<4x8x1xf32>
    %51 = tpu.reciprocal %50 {approx = true} : vector<4x8x1xf32> -> vector<4x8x1xf32>
    %52 = vector.broadcast %51 : vector<4x8x1xf32> to vector<4x8x8xf32>
    %53 = arith.mulf %48, %52 : vector<4x8x8xf32>
    %54 = arith.truncf %53 : vector<4x8x8xf32> to vector<4x8x8xbf16>
    %55 = arith.truncf %34 : vector<4x8x8xf32> to vector<4x8x8xbf16>
    "tpu.trace_start"() <{level = 10 : i32, message = "bqk,bkd->bqd"}> : () -> ()
    %cst_15 = arith.constant dense<0.000000e+00> : vector<4x8x8xf32>
    %56 = tpu.matmul %54, %55, %cst_15 {dimension_numbers = #tpu.dot_dimension_numbers<[2], [1], [1], [2], [0, 0, 0, 1, 1, 2], [0], [0]>} : vector<4x8x8xbf16>, vector<4x8x8xbf16>, vector<4x8x8xf32> -> vector<4x8x8xf32>
    "tpu.trace_stop"() : () -> ()
    %57 = vector.extract_strided_slice %56 {offsets = [0, 0, 0], sizes = [1, 8, 8], strides = [1, 1, 1]} : vector<4x8x8xf32> to vector<1x8x8xf32>
    %58 = vector.shape_cast %57 : vector<1x8x8xf32> to vector<8x8xf32>
    %c0_16 = arith.constant 0 : index
    %c0_17 = arith.constant 0 : index
    %59 = vector.load %arg20[%c0_16, %c0_17] : memref<8x32xf32, #tpu.memory_space<vmem>>, vector<8x8xf32>
    tpu.vector_store %arg20[%c0_16, %c0_17], %58 {strides = array<i32>} : memref<8x32xf32, #tpu.memory_space<vmem>>, vector<8x8xf32>,
    %60 = vector.extract_strided_slice %56 {offsets = [1, 0, 0], sizes = [1, 8, 8], strides = [1, 1, 1]} : vector<4x8x8xf32> to vector<1x8x8xf32>
    %61 = vector.shape_cast %60 : vector<1x8x8xf32> to vector<8x8xf32>
    %c0_18 = arith.constant 0 : index
    %c8 = arith.constant 8 : index
    %62 = vector.load %arg20[%c0_18, %c8] : memref<8x32xf32, #tpu.memory_space<vmem>>, vector<8x8xf32>
    tpu.vector_store %arg20[%c0_18, %c8], %61 {strides = array<i32>} : memref<8x32xf32, #tpu.memory_space<vmem>>, vector<8x8xf32>,
    %63 = vector.extract_strided_slice %56 {offsets = [2, 0, 0], sizes = [1, 8, 8], strides = [1, 1, 1]} : vector<4x8x8xf32> to vector<1x8x8xf32>
    %64 = vector.shape_cast %63 : vector<1x8x8xf32> to vector<8x8xf32>
    %c0_19 = arith.constant 0 : index
    %c16 = arith.constant 16 : index
    %65 = vector.load %arg20[%c0_19, %c16] : memref<8x32xf32, #tpu.memory_space<vmem>>, vector<8x8xf32>
    tpu.vector_store %arg20[%c0_19, %c16], %64 {strides = array<i32>} : memref<8x32xf32, #tpu.memory_space<vmem>>, vector<8x8xf32>,
    %66 = vector.extract_strided_slice %56 {offsets = [3, 0, 0], sizes = [1, 8, 8], strides = [1, 1, 1]} : vector<4x8x8xf32> to vector<1x8x8xf32>
    %67 = vector.shape_cast %66 : vector<1x8x8xf32> to vector<8x8xf32>
    %c0_20 = arith.constant 0 : index
    %c24 = arith.constant 24 : index
    %68 = vector.load %arg20[%c0_20, %c24] : memref<8x32xf32, #tpu.memory_space<vmem>>, vector<8x8xf32>
    tpu.vector_store %arg20[%c0_20, %c24], %67 {strides = array<i32>} : memref<8x32xf32, #tpu.memory_space<vmem>>, vector<8x8xf32>,
    %c0_21 = arith.constant 0 : index
    %c0_22 = arith.constant 0 : index
    %69 = vector.load %arg20[%c0_21, %c0_22] : memref<8x32xf32, #tpu.memory_space<vmem>>, vector<8x32xf32>
    %70 = arith.truncf %69 : vector<8x32xf32> to vector<8x32xbf16>
    %c0_23 = arith.constant 0 : index
    %c0_24 = arith.constant 0 : index
    %c0_25 = arith.constant 0 : index
    %71 = vector.load %arg6[%c0_23, %c0_24, %c0_25] : memref<1x32x32xbf16, #tpu.memory_space<vmem>>, vector<1x32x32xbf16>
    %72 = vector.shape_cast %71 : vector<1x32x32xbf16> to vector<32x32xbf16>
    %cst_26 = arith.constant dense<0.000000e+00> : vector<8x32xf32>
    %73 = tpu.matmul %70, %72, %cst_26 {dimension_numbers = #tpu.dot_dimension_numbers<[1], [0], [0], [1], [0, 0, 1, 1], [], []>} : vector<8x32xbf16>, vector<32x32xbf16>, vector<8x32xf32> -> vector<8x32xf32>
    %c0_27 = arith.constant 0 : index
    %c0_28 = arith.constant 0 : index
    %c0_29 = arith.constant 0 : index
    %74 = vector.load %arg7[%c0_27, %c0_28, %c0_29] : memref<1x1x32xf32, #tpu.memory_space<vmem>>, vector<1x1x32xf32>
    %75 = vector.shape_cast %74 : vector<1x1x32xf32> to vector<1x32xf32>
    %76 = vector.broadcast %75 : vector<1x32xf32> to vector<8x32xf32>
    %77 = arith.addf %73, %76 : vector<8x32xf32>
    %78 = arith.addf %3, %77 : vector<8x32xf32>
    %c0_30 = arith.constant 0 : index
    %c0_31 = arith.constant 0 : index
    %c0_32 = arith.constant 0 : index
    %79 = vector.load %arg12[%c0_30, %c0_31, %c0_32] : memref<1x1x32xf32, #tpu.memory_space<vmem>>, vector<1x1x32xf32>
    %80 = vector.shape_cast %79 : vector<1x1x32xf32> to vector<1x32xf32>
    %c0_33 = arith.constant 0 : index
    %c0_34 = arith.constant 0 : index
    %c0_35 = arith.constant 0 : index
    %81 = vector.load %arg13[%c0_33, %c0_34, %c0_35] : memref<1x1x32xf32, #tpu.memory_space<vmem>>, vector<1x1x32xf32>
    %82 = vector.shape_cast %81 : vector<1x1x32xf32> to vector<1x32xf32>
    %cst_36 = arith.constant dense<0.000000e+00> : vector<8xf32>
    %83 = vector.multi_reduction <add>, %78, %cst_36 [1] : vector<8x32xf32> to vector<8xf32>
    %84 = vector.shape_cast %83 : vector<8xf32> to vector<8x1xf32>
    %cst_37 = arith.constant 3.200000e+01 : f32
    %85 = vector.broadcast %cst_37 : f32 to vector<8x1xf32>
    %86 = arith.divf %84, %85 : vector<8x1xf32>
    %87 = arith.mulf %78, %78 : vector<8x32xf32>
    %cst_38 = arith.constant dense<0.000000e+00> : vector<8xf32>
    %88 = vector.multi_reduction <add>, %87, %cst_38 [1] : vector<8x32xf32> to vector<8xf32>
    %89 = vector.shape_cast %88 : vector<8xf32> to vector<8x1xf32>
    %cst_39 = arith.constant 3.200000e+01 : f32
    %90 = vector.broadcast %cst_39 : f32 to vector<8x1xf32>
    %91 = arith.divf %89, %90 : vector<8x1xf32>
    %92 = arith.mulf %86, %86 : vector<8x1xf32>
    %93 = arith.subf %91, %92 : vector<8x1xf32>
    %94 = vector.broadcast %86 : vector<8x1xf32> to vector<8x32xf32>
    %95 = arith.subf %78, %94 : vector<8x32xf32>
    %cst_40 = arith.constant 9.99999974E-6 : f32
    %96 = vector.broadcast %cst_40 : f32 to vector<8x1xf32>
    %97 = arith.addf %93, %96 : vector<8x1xf32>
    %98 = math.rsqrt %97 : vector<8x1xf32>
    %99 = vector.broadcast %98 : vector<8x1xf32> to vector<8x32xf32>
    %100 = arith.mulf %95, %99 : vector<8x32xf32>
    %101 = vector.broadcast %80 : vector<1x32xf32> to vector<8x32xf32>
    %102 = arith.mulf %100, %101 : vector<8x32xf32>
    %103 = vector.broadcast %82 : vector<1x32xf32> to vector<8x32xf32>
    %104 = arith.addf %102, %103 : vector<8x32xf32>
    %105 = arith.truncf %104 : vector<8x32xf32> to vector<8x32xbf16>
    %c0_41 = arith.constant 0 : index
    %c0_42 = arith.constant 0 : index
    %c0_43 = arith.constant 0 : index
    %106 = vector.load %arg8[%c0_41, %c0_42, %c0_43] : memref<1x32x64xbf16, #tpu.memory_space<vmem>>, vector<1x32x64xbf16>
    %107 = vector.shape_cast %106 : vector<1x32x64xbf16> to vector<32x64xbf16>
    %cst_44 = arith.constant dense<0.000000e+00> : vector<8x64xf32>
    %108 = tpu.matmul %105, %107, %cst_44 {dimension_numbers = #tpu.dot_dimension_numbers<[1], [0], [0], [1], [0, 0, 1, 1], [], []>} : vector<8x32xbf16>, vector<32x64xbf16>, vector<8x64xf32> -> vector<8x64xf32>
    %c0_45 = arith.constant 0 : index
    %c0_46 = arith.constant 0 : index
    %c0_47 = arith.constant 0 : index
    %109 = vector.load %arg9[%c0_45, %c0_46, %c0_47] : memref<1x1x64xf32, #tpu.memory_space<vmem>>, vector<1x1x64xf32>
    %110 = vector.shape_cast %109 : vector<1x1x64xf32> to vector<1x64xf32>
    %111 = vector.broadcast %110 : vector<1x64xf32> to vector<8x64xf32>
    %112 = arith.addf %108, %111 : vector<8x64xf32>
    %cst_48 = arith.constant 0.000000e+00 : f32
    %113 = vector.broadcast %cst_48 : f32 to vector<8x64xf32>
    %114 = arith.maximumf %112, %113 : vector<8x64xf32>
    %115 = arith.truncf %114 : vector<8x64xf32> to vector<8x64xbf16>
    %c0_49 = arith.constant 0 : index
    %c0_50 = arith.constant 0 : index
    %c0_51 = arith.constant 0 : index
    %116 = vector.load %arg10[%c0_49, %c0_50, %c0_51] : memref<1x64x32xbf16, #tpu.memory_space<vmem>>, vector<1x64x32xbf16>
    %117 = vector.shape_cast %116 : vector<1x64x32xbf16> to vector<64x32xbf16>
    %cst_52 = arith.constant dense<0.000000e+00> : vector<8x32xf32>
    %118 = tpu.matmul %115, %117, %cst_52 {dimension_numbers = #tpu.dot_dimension_numbers<[1], [0], [0], [1], [0, 0, 1, 1], [], []>} : vector<8x64xbf16>, vector<64x32xbf16>, vector<8x32xf32> -> vector<8x32xf32>
    %c0_53 = arith.constant 0 : index
    %c0_54 = arith.constant 0 : index
    %c0_55 = arith.constant 0 : index
    %119 = vector.load %arg11[%c0_53, %c0_54, %c0_55] : memref<1x1x32xf32, #tpu.memory_space<vmem>>, vector<1x1x32xf32>
    %120 = vector.shape_cast %119 : vector<1x1x32xf32> to vector<1x32xf32>
    %121 = vector.broadcast %120 : vector<1x32xf32> to vector<8x32xf32>
    %122 = arith.addf %118, %121 : vector<8x32xf32>
    %123 = arith.addf %104, %122 : vector<8x32xf32>
    %c0_56 = arith.constant 0 : index
    %c0_57 = arith.constant 0 : index
    %c0_58 = arith.constant 0 : index
    %124 = vector.load %arg14[%c0_56, %c0_57, %c0_58] : memref<1x1x32xf32, #tpu.memory_space<vmem>>, vector<1x1x32xf32>
    %125 = vector.shape_cast %124 : vector<1x1x32xf32> to vector<1x32xf32>
    %c0_59 = arith.constant 0 : index
    %c0_60 = arith.constant 0 : index
    %c0_61 = arith.constant 0 : index
    %126 = vector.load %arg15[%c0_59, %c0_60, %c0_61] : memref<1x1x32xf32, #tpu.memory_space<vmem>>, vector<1x1x32xf32>
    %127 = vector.shape_cast %126 : vector<1x1x32xf32> to vector<1x32xf32>
    %cst_62 = arith.constant dense<0.000000e+00> : vector<8xf32>
    %128 = vector.multi_reduction <add>, %123, %cst_62 [1] : vector<8x32xf32> to vector<8xf32>
    %129 = vector.shape_cast %128 : vector<8xf32> to vector<8x1xf32>
    %cst_63 = arith.constant 3.200000e+01 : f32
    %130 = vector.broadcast %cst_63 : f32 to vector<8x1xf32>
    %131 = arith.divf %129, %130 : vector<8x1xf32>
    %132 = arith.mulf %123, %123 : vector<8x32xf32>
    %cst_64 = arith.constant dense<0.000000e+00> : vector<8xf32>
    %133 = vector.multi_reduction <add>, %132, %cst_64 [1] : vector<8x32xf32> to vector<8xf32>
    %134 = vector.shape_cast %133 : vector<8xf32> to vector<8x1xf32>
    %cst_65 = arith.constant 3.200000e+01 : f32
    %135 = vector.broadcast %cst_65 : f32 to vector<8x1xf32>
    %136 = arith.divf %134, %135 : vector<8x1xf32>
    %137 = arith.mulf %131, %131 : vector<8x1xf32>
    %138 = arith.subf %136, %137 : vector<8x1xf32>
    %139 = vector.broadcast %131 : vector<8x1xf32> to vector<8x32xf32>
    %140 = arith.subf %123, %139 : vector<8x32xf32>
    %cst_66 = arith.constant 9.99999974E-6 : f32
    %141 = vector.broadcast %cst_66 : f32 to vector<8x1xf32>
    %142 = arith.addf %138, %141 : vector<8x1xf32>
    %143 = math.rsqrt %142 : vector<8x1xf32>
    %144 = vector.broadcast %143 : vector<8x1xf32> to vector<8x32xf32>
    %145 = arith.mulf %140, %144 : vector<8x32xf32>
    %146 = vector.broadcast %125 : vector<1x32xf32> to vector<8x32xf32>
    %147 = arith.mulf %145, %146 : vector<8x32xf32>
    %148 = vector.broadcast %127 : vector<1x32xf32> to vector<8x32xf32>
    %149 = arith.addf %147, %148 : vector<8x32xf32>
    %c0_67 = arith.constant 0 : index
    %c0_68 = arith.constant 0 : index
    %150 = vector.load %arg19[%c0_67, %c0_68] : memref<8x32xf32, #tpu.memory_space<vmem>>, vector<8x32xf32>
    tpu.vector_store %arg19[%c0_67, %c0_68], %149 {strides = array<i32>} : memref<8x32xf32, #tpu.memory_space<vmem>>, vector<8x32xf32>,
    %c1_i32 = arith.constant 1 : i32
    %151 = arith.cmpi eq, %arg1, %c1_i32 : i32
    %152 = arith.extui %151 : i1 to i32
    %c0_i32_69 = arith.constant 0 : i32
    %153 = arith.cmpi ne, %152, %c0_i32_69 : i32
    scf.if %153 {
      %154 = arith.truncf %149 : vector<8x32xf32> to vector<8x32xbf16>
      %c0_70 = arith.constant 0 : index
      %c0_71 = arith.constant 0 : index
      %155 = vector.load %arg16[%c0_70, %c0_71] : memref<32x2xbf16, #tpu.memory_space<vmem>>, vector<32x2xbf16>
      %cst_72 = arith.constant dense<0.000000e+00> : vector<8x2xf32>
      %156 = tpu.matmul %154, %155, %cst_72 {dimension_numbers = #tpu.dot_dimension_numbers<[1], [0], [0], [1], [0, 0, 1, 1], [], []>} : vector<8x32xbf16>, vector<32x2xbf16>, vector<8x2xf32> -> vector<8x2xf32>
      %c0_73 = arith.constant 0 : index
      %c0_74 = arith.constant 0 : index
      %157 = vector.load %arg17[%c0_73, %c0_74] : memref<1x2xf32, #tpu.memory_space<vmem>>, vector<1x2xf32>
      %158 = vector.broadcast %157 : vector<1x2xf32> to vector<8x2xf32>
      %159 = arith.addf %156, %158 : vector<8x2xf32>
      %cst_75 = arith.constant dense<0xFF800000> : vector<8xf32>
      %160 = vector.multi_reduction <maximumf>, %159, %cst_75 [1] : vector<8x2xf32> to vector<8xf32>
      %161 = vector.shape_cast %160 : vector<8xf32> to vector<8x1xf32>
      %162 = vector.broadcast %161 : vector<8x1xf32> to vector<8x2xf32>
      %163 = arith.subf %159, %162 : vector<8x2xf32>
      %164 = math.exp %163 : vector<8x2xf32>
      %cst_76 = arith.constant dense<0.000000e+00> : vector<8xf32>
      %165 = vector.multi_reduction <add>, %164, %cst_76 [1] : vector<8x2xf32> to vector<8xf32>
      %166 = vector.shape_cast %165 : vector<8xf32> to vector<8x1xf32>
      %167 = vector.broadcast %166 : vector<8x1xf32> to vector<8x2xf32>
      %168 = arith.divf %164, %167 : vector<8x2xf32>
      %169 = vector.shape_cast %168 : vector<8x2xf32> to vector<1x8x2xf32>
      %c0_77 = arith.constant 0 : index
      %c0_78 = arith.constant 0 : index
      %c0_79 = arith.constant 0 : index
      %170 = vector.load %arg18[%c0_77, %c0_78, %c0_79] : memref<1x8x2xf32, #tpu.memory_space<vmem>>, vector<1x8x2xf32>
      tpu.vector_store %arg18[%c0_77, %c0_78, %c0_79], %169 {strides = array<i32>} : memref<1x8x2xf32, #tpu.memory_space<vmem>>, vector<1x8x2xf32>,
    } else {
    }
    return
  }
  func.func @transform_0(%arg0: i32, %arg1: i32) -> (i32, i32, i32) {
    %c0_i32 = arith.constant 0 : i32
    %c0_i32_0 = arith.constant 0 : i32
    %c0_i32_1 = arith.constant 0 : i32
    return %arg0, %c0_i32, %c0_i32_0 : i32, i32, i32
  }
  func.func @transform_1(%arg0: i32, %arg1: i32) -> (i32, i32) {
    %c0_i32 = arith.constant 0 : i32
    %c0_i32_0 = arith.constant 0 : i32
    %c0_i32_1 = arith.constant 0 : i32
    return %c0_i32, %c0_i32_0 : i32, i32
  }
  func.func @transform_2(%arg0: i32, %arg1: i32) -> (i32, i32, i32) {
    %c0_i32 = arith.constant 0 : i32
    %c0_i32_0 = arith.constant 0 : i32
    %c0_i32_1 = arith.constant 0 : i32
    return %arg1, %c0_i32, %c0_i32_0 : i32, i32, i32
  }
  func.func @transform_3(%arg0: i32, %arg1: i32) -> (i32, i32, i32) {
    %c0_i32 = arith.constant 0 : i32
    %c0_i32_0 = arith.constant 0 : i32
    %c0_i32_1 = arith.constant 0 : i32
    return %arg1, %c0_i32, %c0_i32_0 : i32, i32, i32
  }
  func.func @transform_4(%arg0: i32, %arg1: i32) -> (i32, i32, i32) {
    %c0_i32 = arith.constant 0 : i32
    %c0_i32_0 = arith.constant 0 : i32
    %c0_i32_1 = arith.constant 0 : i32
    return %arg1, %c0_i32, %c0_i32_0 : i32, i32, i32
  }
  func.func @transform_5(%arg0: i32, %arg1: i32) -> (i32, i32, i32) {
    %c0_i32 = arith.constant 0 : i32
    %c0_i32_0 = arith.constant 0 : i32
    %c0_i32_1 = arith.constant 0 : i32
    return %arg1, %c0_i32, %c0_i32_0 : i32, i32, i32
  }
  func.func @transform_6(%arg0: i32, %arg1: i32) -> (i32, i32, i32) {
    %c0_i32 = arith.constant 0 : i32
    %c0_i32_0 = arith.constant 0 : i32
    %c0_i32_1 = arith.constant 0 : i32
    return %arg1, %c0_i32, %c0_i32_0 : i32, i32, i32
  }
  func.func @transform_7(%arg0: i32, %arg1: i32) -> (i32, i32, i32) {
    %c0_i32 = arith.constant 0 : i32
    %c0_i32_0 = arith.constant 0 : i32
    %c0_i32_1 = arith.constant 0 : i32
    return %arg1, %c0_i32, %c0_i32_0 : i32, i32, i32
  }
  func.func @transform_8(%arg0: i32, %arg1: i32) -> (i32, i32, i32) {
    %c0_i32 = arith.constant 0 : i32
    %c0_i32_0 = arith.constant 0 : i32
    %c0_i32_1 = arith.constant 0 : i32
    return %arg1, %c0_i32, %c0_i32_0 : i32, i32, i32
  }
  func.func @transform_9(%arg0: i32, %arg1: i32) -> (i32, i32, i32) {
    %c0_i32 = arith.constant 0 : i32
    %c0_i32_0 = arith.constant 0 : i32
    %c0_i32_1 = arith.constant 0 : i32
    return %arg1, %c0_i32, %c0_i32_0 : i32, i32, i32
  }
  func.func @transform_10(%arg0: i32, %arg1: i32) -> (i32, i32, i32) {
    %c0_i32 = arith.constant 0 : i32
    %c0_i32_0 = arith.constant 0 : i32
    %c0_i32_1 = arith.constant 0 : i32
    return %arg1, %c0_i32, %c0_i32_0 : i32, i32, i32
  }
  func.func @transform_11(%arg0: i32, %arg1: i32) -> (i32, i32, i32) {
    %c0_i32 = arith.constant 0 : i32
    %c0_i32_0 = arith.constant 0 : i32
    %c0_i32_1 = arith.constant 0 : i32
    return %arg1, %c0_i32, %c0_i32_0 : i32, i32, i32
  }
  func.func @transform_12(%arg0: i32, %arg1: i32) -> (i32, i32, i32) {
    %c0_i32 = arith.constant 0 : i32
    %c0_i32_0 = arith.constant 0 : i32
    %c0_i32_1 = arith.constant 0 : i32
    return %arg1, %c0_i32, %c0_i32_0 : i32, i32, i32
  }
  func.func @transform_13(%arg0: i32, %arg1: i32) -> (i32, i32, i32) {
    %c0_i32 = arith.constant 0 : i32
    %c0_i32_0 = arith.constant 0 : i32
    %c0_i32_1 = arith.constant 0 : i32
    return %arg1, %c0_i32, %c0_i32_0 : i32, i32, i32
  }
  func.func @transform_14(%arg0: i32, %arg1: i32) -> (i32, i32) {
    %c0_i32 = arith.constant 0 : i32
    %c0_i32_0 = arith.constant 0 : i32
    %c0_i32_1 = arith.constant 0 : i32
    return %c0_i32, %c0_i32_0 : i32, i32
  }
  func.func @transform_15(%arg0: i32, %arg1: i32) -> (i32, i32) {
    %c0_i32 = arith.constant 0 : i32
    %c0_i32_0 = arith.constant 0 : i32
    %c0_i32_1 = arith.constant 0 : i32
    return %c0_i32, %c0_i32_0 : i32, i32
  }
  func.func @transform_16(%arg0: i32, %arg1: i32) -> (i32, i32, i32) {
    %c0_i32 = arith.constant 0 : i32
    %c0_i32_0 = arith.constant 0 : i32
    %c0_i32_1 = arith.constant 0 : i32
    return %arg0, %c0_i32, %c0_i32_0 : i32, i32, i32
  }
}

</mosaic_0001>

<bundles_post_ra>
// kernel: transformer_forward.1
= control target key start
LH: loop header
LB: loop body
LE: loop exit
PB: predicated region body
PF: predicated region fallthrough
CT: control target
= control target key end

     0   :  { %s2247_s21 = smov 0   ;;  %s2249_s22 = smov 0   ;;  %s2525_s0 = inlined_call_operand.vmem [shape: f32[2,8,32], index: 0, kind: input, shape index: {}]   ;;  %s2526_s1 = inlined_call_operand.vmem [shape: f32[8,8], index: 1, kind: input, shape index: {}]   ;;  %s2527_s2 = inlined_call_operand.vmem [shape: bf16[2,32,96], index: 2, kind: input, shape index: {}]   ;;  %s2528_s3 = inlined_call_operand.vmem [shape: f32[2,1,96], index: 3, kind: input, shape index: {}]   ;;  %s2529_s4 = inlined_call_operand.vmem [shape: bf16[2,32,32], index: 4, kind: input, shape index: {}]   ;;  %s2530_s5 = inlined_call_operand.vmem [shape: f32[2,1,32], index: 5, kind: input, shape index: {}]   ;;  %s2531_s6 = inlined_call_operand.vmem [shape: bf16[2,32,64], index: 6, kind: input, shape index: {}]   ;;  %s2532_s7 = inlined_call_operand.vmem [shape: f32[2,1,64], index: 7, kind: input, shape index: {}]   ;;  %s2533_s8 = inlined_call_operand.vmem [shape: bf16[2,64,32], index: 8, kind: input, shape index: {}]   ;;  %s2534_s9 = inlined_call_operand.vmem [shape: f32[2,1,32], index: 9, kind: input, shape index: {}]   ;;  %s2535_s10 = inlined_call_operand.vmem [shape: f32[2,1,32], index: 10, kind: input, shape index: {}]   ;;  %s2536_s11 = inlined_call_operand.vmem [shape: f32[2,1,32], index: 11, kind: input, shape index: {}]   ;;  %s2537_s12 = inlined_call_operand.vmem [shape: f32[2,1,32], index: 12, kind: input, shape index: {}]   ;;  %s2538_s13 = inlined_call_operand.vmem [shape: f32[2,1,32], index: 13, kind: input, shape index: {}]   ;;  %s2539_s14 = inlined_call_operand.vmem [shape: bf16[32,2], index: 14, kind: input, shape index: {}]   ;;  %s2540_s15 = inlined_call_operand.vmem [shape: f32[1,2], index: 15, kind: input, shape index: {}]   ;;  %s2541_s16 = inlined_call_operand.vmem [shape: f32[2,8,2], index: 16, kind: output, shape index: {}]  }
   0x1   :  { %2548 = sst [smem:[#allocation11_spill]] %s2525_s0  ;;  %s2251_s23 = smov 0  }
   0x2   :  { %2549 = sst [smem:[#allocation12_spill]] %s2526_s1  ;;  %s2253_s24 = smov 0  }
   0x3   :  { %2550 = sst [smem:[#allocation13_spill]] %s2527_s2  ;;  %s2255_s25 = smov 0  }
   0x4   :  { %2551 = sst [smem:[#allocation14_spill]] %s2529_s4 }
   0x5   :  { %2552 = sst [smem:[#allocation15_spill]] %s2531_s6 }
   0x6   :  { %2553 = sst [smem:[#allocation16_spill]] %s2533_s8 }
   0x7   :  { %2554 = sst [smem:[#allocation17_spill]] %s2539_s14 }
   0x8   :  { %2555 = sst [smem:[#allocation18_spill]] %s2540_s15 }
   0x9   :  { %2556 = sst [smem:[#allocation19_spill]] %s2541_s16 }
   0xa LB: > { %2557 = sst [smem:[#allocation4_spill]] %s2132_s21  ;;  %s35_s26 = sadd.s32 1, %s2140_s23  ;;  %s2148_s25 = sphi %s2255_s25, %s26_s25   ;;  %s2144_s24 = sphi %s2253_s24, %s2584_s24   ;;  %s2140_s23 = sphi %s2251_s23, %s2583_s23   ;;  %s2136_s22 = sphi %s2249_s22, %s2582_s22   ;;  %s2132_s21 = sphi %s2247_s21, %s2581_s21  }
   0xb   : > { %2558 = sst [smem:[#allocation5_spill]] %s2140_s23  ;;  %s38_s27 = sadd.s32 1, %s2144_s24 }
   0xc   : > { %2559 = sst [smem:[#allocation6_spill]] %s2144_s24  ;;  %p36_p0 = scmp.ge.s32.totalorder %s35_s26, 2 }
   0xd   : > { %2560 = sst [smem:[#allocation7_spill]] %s2148_s25  ;;  %p1844_p1 = scmp.ge.s32.totalorder %s2148_s25, 1 }
   0xe   : > { %p577_p2 = scmp.lt.s32.totalorder %s2148_s25, 5  ;;  %s2586_s26 = smov (%p36_p0, %s35_s26), 0 }
   0xf   : > { %2561 = sst [smem:[#allocation8_spill]] %s2586_s26  ;;  %s2588_s27 = smov (!%p36_p0, %s38_s27), %s2144_s24 }
  0x10   : > { %p578_p3 = pnand %p1844_p1, %p577_p2  ;;  %p40_p4 = scmp.ge.s32.totalorder %s2588_s27, 2 }
  0x12   : > { %s2590_s27 = smov (%p40_p4, %s2588_s27), 0  ;;  %581 = sbr.rel (%p578_p3) target bundleno = 2911 (0xb5f), region = 84 }
  0x13   : > { %2562 = sst [smem:[#allocation9_spill]] %s2590_s27 }
  0x19   : > { %p669_p5 = scmp.lt.s32.totalorder %s2136_s22, 1  ;;  %p673_p6 = scmp.lt.s32.totalorder %s2132_s21, 1 }
  0x1a   : > { %s2563_s17 = sld [smem:[#allocation11_spill]]  ;;  %s2564_s2 = sld [smem:[#allocation13_spill]] }
  0x1b   : > { %s2592_s22 = smov (!%p669_p5, %s2136_s22), 1  ;;  %s2565_s4 = sld [smem:[#allocation14_spill]] }
  0x1c   : > { %s2281_s28 = scalar_select %p673_p6, %s2132_s21, 1 }
  0x1d   : > { %s1845_s29 = sshll.u32 %s2592_s22, 3  ;;  %s2567_s6 = sld [smem:[#allocation15_spill]] }
  0x1e   : > { %s1893_s19 = sshll.u32 %s2281_s28, 4  ;;  %s1896_s23 = sshll.u32 %s2281_s28, 5 }
  0x1f   : > { %s2568_s8 = sld [smem:[#allocation16_spill]]  ;;  %s707_s30 = scalar_lea.vmem %s2535_s10, %s2281_s28 }
  0x20   : > { %s672_s18 = scalar_lea.vmem %s2563_s17, %s1845_s29  ;;  %s677_s26 = scalar_lea.vmem %s2564_s2, %s1893_s19 }
  0x21   : > { %s2297_s1 = scalar_lea.vmem %s2565_s4, %s1893_s19  ;;  %s710_s16 = scalar_lea.vmem %s2536_s11, %s2281_s28 }
  0x22   : > { %2566 = sst [smem:[#allocation10_spill]] %s2297_s1  ;;  %s713_s2 = scalar_lea.vmem %s2537_s12, %s2281_s28 }
  0x23   : > { %s2306_s17 = scalar_lea.vmem %s2567_s6, %s1893_s19  ;;  %s716_s24 = scalar_lea.vmem %s2538_s13, %s2281_s28 }
  0x25   : > { %s2320_s1 = scalar_lea.vmem %s2568_s8, %s1896_s23  ;;  %s2569_s23 = sld [smem:[#allocation19_spill]] }
  0x26   : > { %s2570_s8 = sld [smem:[#allocation4_spill]] }
  0x2b   : > { %s2341_s15 = scalar_lea.vmem %s2569_s23, %s1845_s29 }
  0x2c   : > { %p1855_p7 = scmp.ne.s32.totalorder %s2570_s8, 0 }
  0x2d   : > { %v726_v0 = vld [vmem:[%s672_s18] sm:$0xff] (!%p1855_p7)  ;;  %vm727_vm0 = vcmask (!%p1855_p7), 261120  }
  0x2e   : > { %725 = sbr.rel (%p1855_p7) target bundleno = 53 (0x35), region = 88  ;;  %728 = vst.msk [vmem:[#allocation2] sm:$0xff] (!%p1855_p7), %vm727_vm0, %v726_v0 }
  0x35 PF: > { %v2074_v1 = vld [vmem:[%s677_s26] sm:$0xff]   ;;  %v2150_v2 = vmov 0.0   ;;  %v2075_v3 = vld [vmem:[%s677_s26 + $0x8] sm:$0xff]   ;;  %vm2151_vm1 = vmmov 0   ;;  %vm754_vm2 = vcmask 261120   ;;  %s2571_s26 = scalar_lea.vmem %s2528_s3, %s2281_s28  ;;  %s2152_s29 = smov 104  }
  0x36   : > { %1930 = vmatprep.subr.bf16.mxu0 %v2150_v2  ;;  %1938 = vmatprep.subr.bf16.mxu1 %v2150_v2  ;;  %v2348_v4 = vld [vmem:[#allocation2] sm:$0xff]  ;;  %s2153_s18 = smov 120   ;;  %s2154_s14 = smov 112   ;;  %vm832_vm3 = vcmask 64512   ;;  %vm1079_vm4 = vcmask 1043456   ;;  %vm1272_vm5 = vcmask 130112  }
  0x37   : > { %1931 = vmatpush3.bf16.msra.mxu0 %v2074_v1  ;;  %1934 = vmatprep.mubr.msk.bf16.mxu0 %vm2151_vm1, %v2150_v2  ;;  %v730_v5 = vpack.c.bf16 %v2348_v4, %v2348_v4  ;;  %v1856_v6 = vld [vmem:[%s2571_s26] ss:$0 sm:$0xff]  ;;  %s2155_s21 = smov 96   ;;  %s2572_s0 = sld [smem:[#allocation12_spill]]  ;;  %vm1278_vm6 = vcmask 195712   ;;  %vm1284_vm7 = vcmask 261312  }
  0x38   : > { %1932 = vmatprep.subr.bf16.mxu0 %v2150_v2  ;;  %1940 = vmatprep.mubr.msk.bf16.mxu1 %vm2151_vm1, %v2150_v2  ;;  %s2156_s27 = smov 64   ;;  %s2573_s20 = sld [smem:[#allocation10_spill]]  ;;  %vm1495_vm8 = vcmask 523264  }
  0x39   : > { %s2157_s25 = smov 8   ;;  %s2158_s4 = smov 16  }
  0x3a   : > { %s2159_s23 = smov 24   ;;  %s2574_s26 = scalar_lea.vmem %s2530_s5, %s2281_s28 }
  0x3b   : > { %1933 = vmatpush3.bf16.msra.mxu0 %v2075_v3  ;;  %s2575_s22 = scalar_lea.vmem %s2532_s7, %s2281_s28 }
  0x3c   : > { %1944 = vmatprep.subr.bf16.mxu0 %v2150_v2 }
  0x3d   : > { %v819_v35 = vld [vmem:[%s2572_s0] sm:$0xff]  ;;  %s2576_s0 = scalar_lea.vmem %s2534_s9, %s2281_s28 }
  0x3e   : > { %1935 = vmatmul.mubr.msk.bf16.vlgmr.msra.gmra.mrb[0].mxu0 %vm754_vm2, %v730_v5  ;;  %v820_v36 = vmax.f32 %v819_v35, -1e+30 }
  0x3f   : > { %1946 = vmatprep.mubr.msk.bf16.mxu0 %vm2151_vm1, %v2150_v2 }
 0x111   : > { %v792_v7 = vpop.f32.mrb[0].mxu0 }
 0x112   : > { %v793_v8 = vadd.f32 %v1856_v6, %v792_v7  ;;  %v1936_v9 = vpop.f32.mrb[1].mxu0 }
 0x113   : > { %v795_v10 = vpop.f32.mrb[2].mxu0 }
 0x114   : > { %816 = vrot.lane.b32.xlu1 %v793_v8, %s2152_s29  ;;  %810 = vrot.lane.b32.xlu0 %v793_v8, %s2153_s18  ;;  %v1937_v11 = vpop.f32.mrb[3].mxu0  ;;  %v2364_v12 = vpack.c.bf16 %v793_v8, %v793_v8  ;;  %v798_v13 = vmul.f32 0.35355338, %v793_v8 }
 0x116   : > { %v821_v22 = vpack.c.bf16 %v798_v13, %v798_v13 }
 0x118   : > { %813 = vrot.lane.b32.xlu0 %v793_v8, %s2154_s14  ;;  %830 = vrot.lane.b32.xlu1 %v2364_v12, %s2155_s21 }
 0x11c   : > { %800 = vrot.lane.b32.xlu1 %v798_v13, %s2153_s18 }
 0x186   : > { %v817_v14 = vpop.permute.xlu1 %816  ;;  %v811_v15 = vpop.permute.xlu0 %810 }
 0x187   : > { %v2367_v16 = vpack.c.bf16 %v817_v14, %v817_v14  ;;  %v2369_v17 = vpack.c.bf16 %v811_v15, %v811_v15 }
 0x189   : > { %880 = vrot.lane.b32.xlu0 %v2369_v17, %s2155_s21  ;;  %978 = vrot.lane.b32.xlu1 %v2367_v16, %s2155_s21 }
 0x18a   : > { %v814_v18 = vpop.permute.xlu0 %813  ;;  %v831_v19 = vpop.permute.xlu1 %830 }
 0x18b   : > { %v2373_v20 = vpack.c.bf16 %v814_v18, %v814_v18  ;;  %v837_v21 = vsel %vm832_vm3, %v831_v19, 0 }
 0x18c   : > { %1939 = vmatpush3.bf16.xpose.msra.mxu1 %v837_v21 }
 0x18d   : > { %929 = vrot.lane.b32.xlu0 %v2373_v20, %s2155_s21  ;;  %806 = vrot.lane.b32.xlu1 %v798_v13, %s2152_s29 }
 0x18e   : > { %1950 = vmatprep.subr.bf16.mxu1 %v2150_v2  ;;  %v801_v25 = vpop.permute.xlu1 %800 }
 0x18f   : > { %v822_v29 = vpack.c.bf16 %v801_v25, %v801_v25 }
 0x191   : > { %803 = vrot.lane.b32.xlu0 %v798_v13, %s2154_s14 }
 0x193   : > { %1941 = vmatmul.mubr.msk.bf16.vlgmr.msra.gmra.mrb[0].mxu1 %vm832_vm3, %v821_v22 }
 0x194   : > { %1952 = vmatprep.mubr.msk.bf16.mxu1 %vm2151_vm1, %v2150_v2 }
 0x1fb   : > { %v881_v23 = vpop.permute.xlu0 %880  ;;  %v979_v28 = vpop.permute.xlu1 %978 }
 0x1fc   : > { %v886_v24 = vsel %vm832_vm3, %v881_v23, 0  ;;  %v984_v31 = vsel %vm832_vm3, %v979_v28, 0 }
 0x1fd   : > { %1945 = vmatpush3.bf16.xpose.msra.mxu0 %v886_v24 }
 0x1fe   : > { %1956 = vmatprep.subr.bf16.mxu0 %v2150_v2 }
 0x1ff   : > { %v930_v26 = vpop.permute.xlu0 %929  ;;  %v807_v33 = vpop.permute.xlu1 %806 }
 0x200   : > { %v935_v27 = vsel %vm832_vm3, %v930_v26, 0  ;;  %v824_v34 = vpack.c.bf16 %v807_v33, %v807_v33 }
 0x201   : > { %1951 = vmatpush3.bf16.xpose.msra.mxu1 %v935_v27 }
 0x202   : > { %1962 = vmatprep.subr.bf16.mxu1 %v2150_v2 }
 0x203   : > { %v804_v30 = vpop.permute.xlu0 %803 }
 0x204   : > { %1947 = vmatmul.mubr.msk.bf16.vlgmr.msra.gmra.mrb[4].mxu0 %vm832_vm3, %v822_v29  ;;  %v823_v32 = vpack.c.bf16 %v804_v30, %v804_v30 }
 0x205   : > { %1957 = vmatpush3.bf16.xpose.msra.mxu0 %v984_v31  ;;  %1958 = vmatprep.mubr.msk.bf16.mxu0 %vm2151_vm1, %v2150_v2 }
 0x206   : > { %1968 = vmatprep.subr.bf16.mxu0 %v2150_v2 }
 0x208   : > { %1953 = vmatmul.mubr.msk.bf16.vlgmr.msra.gmra.mrb[4].mxu1 %vm832_vm3, %v823_v32 }
 0x209   : > { %1964 = vmatprep.mubr.msk.bf16.mxu1 %vm2151_vm1, %v2150_v2 }
 0x20c   : > { %1959 = vmatmul.mubr.msk.bf16.vlgmr.msra.gmra.mrb[8].mxu0 %vm832_vm3, %v824_v34 }
 0x20d   : > { %1970 = vmatprep.mubr.msk.bf16.mxu0 %vm2151_vm1, %v2150_v2 }
 0x266   : > { %v873_v37 = vpop.f32.mrb[0].mxu1 }
 0x267   : > { %v874_v38 = vadd.f32 %v873_v37, %v820_v36  ;;  %v1942_v39 = vpop.f32.mrb[1].mxu1 }
 0x268   : > { %v876_v40 = vpop.f32.mrb[2].mxu1 }
 0x269   : > { %v1943_v41 = vpop.f32.mrb[3].mxu1  ;;  %v1026_v42 = vsel %vm832_vm3, %v874_v38, -inf }
 0x26a   : > { %1027 = vmax.xlane.f32.xlu0 %v1026_v42 }
 0x2d7   : > { %v922_v43 = vpop.f32.mrb[4].mxu0 }
 0x2d8   : > { %v923_v44 = vadd.f32 %v922_v43, %v820_v36  ;;  %v1948_v45 = vpop.f32.mrb[5].mxu0 }
 0x2d9   : > { %v925_v46 = vpop.f32.mrb[6].mxu0 }
 0x2da   : > { %v1949_v47 = vpop.f32.mrb[7].mxu0  ;;  %v1029_v48 = vsel %vm832_vm3, %v923_v44, -inf }
 0x2db   : > { %v971_v49 = vpop.f32.mrb[4].mxu1  ;;  %1030 = vmax.xlane.f32.xlu1 %v1029_v48  ;;  %v2076_v47 = vld [vmem:[%s2573_s20] sm:$0xff]   ;;  %v2077_v48 = vld [vmem:[%s2573_s20 + $0x8] sm:$0xff]  }
 0x2dc   : > { %v972_v50 = vadd.f32 %v971_v49, %v820_v36  ;;  %v1954_v51 = vpop.f32.mrb[5].mxu1 }
 0x2dd   : > { %v974_v52 = vpop.f32.mrb[6].mxu1 }
 0x2de   : > { %v1955_v53 = vpop.f32.mrb[7].mxu1  ;;  %v1032_v54 = vsel %vm832_vm3, %v972_v50, -inf }
 0x2df   : > { %1033 = vmax.xlane.f32.xlu0 %v1032_v54  ;;  %v1020_v55 = vpop.f32.mrb[8].mxu0 }
 0x2e0   : > { %v1021_v56 = vadd.f32 %v1020_v55, %v820_v36  ;;  %v1960_v57 = vpop.f32.mrb[9].mxu0 }
 0x2e1   : > { %v1023_v58 = vpop.f32.mrb[10].mxu0 }
 0x2e2   : > { %v1961_v59 = vpop.f32.mrb[11].mxu0  ;;  %v1035_v60 = vsel %vm832_vm3, %v1021_v56, -inf }
 0x2e3   : > { %1036 = vmax.xlane.f32.xlu0 %v1035_v60 }
 0x2ec   : > { %1074 = vrot.lane.b32.xlu1 %v2364_v12, %s2156_s27 }
 0x2f7   : > { %v1028_v61 = vpop.xlane.xlu0 %1027 }
 0x2f8   : > { %v1038_v62 = vsub.f32 %v874_v38, %v1028_v61 }
 0x2fa   : > { %v1042_v63 = vmul.f32 1.442695, %v1038_v62 }
 0x2fc   : > { %2084 = vpow2.f32 %v1042_v63 }
 0x306   : > { %v2085_v0 = vpop.eup %2084 }
 0x307   : > { %v1050_v1 = vsel %vm832_vm3, %v2085_v0, 0.0 }
 0x310   : > { %1051 = vadd.xlane.f32.xlu1 %v1050_v1 }
 0x368   : > { %v1031_v3 = vpop.xlane.xlu1 %1030 }
 0x369   : > { %v1039_v5 = vsub.f32 %v923_v44, %v1031_v3  ;;  %v1868_v3 = vld [vmem:[%s2574_s26] ss:$0 sm:$0xff] }
 0x36b   : > { %v1044_v6 = vmul.f32 1.442695, %v1039_v5 }
 0x36c   : > { %v1034_v7 = vpop.xlane.xlu0 %1033  ;;  %v1075_v8 = vpop.permute.xlu1 %1074 }
 0x36d   : > { %2086 = vpow2.f32 %v1044_v6  ;;  %v1040_v9 = vsub.f32 %v972_v50, %v1034_v7  ;;  %v1081_v10 = vsel %vm1079_vm4, %v1075_v8, 0 }
 0x36e   : > { %1963 = vmatpush3.bf16.msra.mxu1 %v1081_v10 }
 0x36f   : > { %v1046_v11 = vmul.f32 1.442695, %v1040_v9  ;;  %1974 = vmatprep.subr.bf16.mxu1 %v2150_v2 }
 0x370   : > { %v1037_v12 = vpop.xlane.xlu0 %1036 }
 0x371   : > { %2088 = vpow2.f32 %v1046_v11  ;;  %v1041_v13 = vsub.f32 %v1021_v56, %v1037_v12 }
 0x373   : > { %v1048_v14 = vmul.f32 1.442695, %v1041_v13 }
 0x375   : > { %2090 = vpow2.f32 %v1048_v14  ;;  %v2078_v14 = vld [vmem:[%s2306_s17] sm:$0xff]  }
 0x377   : > { %v2087_v15 = vpop.eup %2086 }
 0x378   : > { %v1053_v18 = vsel %vm832_vm3, %v2087_v15, 0.0 }
 0x379   : > { %1054 = vadd.xlane.f32.xlu0 %v1053_v18  ;;  %v2080_v18 = vld [vmem:[%s2320_s1] sm:$0xff]  }
 0x37b   : > { %v2089_v19 = vpop.eup %2088 }
 0x37c   : > { %v1056_v21 = vsel %vm832_vm3, %v2089_v19, 0.0 }
 0x37d   : > { %1057 = vadd.xlane.f32.xlu1 %v1056_v21 }
 0x37f   : > { %v2091_v22 = vpop.eup %2090 }
 0x380   : > { %v1059_v23 = vsel %vm832_vm3, %v2091_v22, 0.0 }
 0x381   : > { %1060 = vadd.xlane.f32.xlu0 %v1059_v23 }
 0x38e   : > { %1171 = vrot.lane.b32.xlu1 %v2373_v20, %s2156_s27 }
 0x392   : > { %1219 = vrot.lane.b32.xlu1 %v2367_v16, %s2156_s27 }
 0x397   : > { %1123 = vrot.lane.b32.xlu0 %v2369_v17, %s2156_s27 }
 0x39d   : > { %v1052_v24 = vpop.xlane.xlu1 %1051 }
 0x39e   : > { %2092 = vrcp.f32 %v1052_v24 }
 0x3a8   : > { %v2093_v25 = vpop.eup %2092 }
 0x3a9   : > { %v1066_v26 = vmul.f32 %v2093_v25, %v2085_v0 }
 0x3ab   : > { %v1070_v27 = vpack.c.bf16 %v1066_v26, %v1066_v26 }
 0x3ad   : > { %1965 = vmatmul.mubr.msk.bf16.vlgmr.msra.gmra.mrb[8].mxu1 %vm832_vm3, %v1070_v27 }
 0x3ae   : > { %1976 = vmatprep.mubr.msk.bf16.mxu1 %vm2151_vm1, %v2150_v2 }
 0x406   : > { %v1055_v28 = vpop.xlane.xlu0 %1054 }
 0x407   : > { %2094 = vrcp.f32 %v1055_v28 }
 0x40a   : > { %v1058_v29 = vpop.xlane.xlu1 %1057 }
 0x40b   : > { %2096 = vrcp.f32 %v1058_v29  ;;  %v1872_v29 = vld [vmem:[%s707_s30] ss:$0 sm:$0xff] }
 0x40e   : > { %v1172_v20 = vpop.permute.xlu1 %1171  ;;  %v1061_v30 = vpop.xlane.xlu0 %1060 }
 0x40f   : > { %v1177_v16 = vsel %vm1079_vm4, %v1172_v20, 0  ;;  %2098 = vrcp.f32 %v1061_v30  ;;  %v1873_v30 = vld [vmem:[%s710_s16] ss:$0 sm:$0xff] }
 0x410   : > { %1975 = vmatpush3.bf16.msra.mxu1 %v1177_v16 }
 0x411   : > { %v2095_v17 = vpop.eup %2094  ;;  %1986 = vmatprep.subr.bf16.mxu1 %v2150_v2 }
 0x412   : > { %v1067_v31 = vmul.f32 %v2095_v17, %v2087_v15  ;;  %v1124_v32 = vpop.permute.xlu0 %1123  ;;  %v1220_v34 = vpop.permute.xlu1 %1219  ;;  %v2079_v15 = vld [vmem:[%s2306_s17 + $0x8] sm:$0xff]  }
 0x413   : > { %v1129_v33 = vsel %vm1079_vm4, %v1124_v32, 0  ;;  %v1225_v38 = vsel %vm1079_vm4, %v1220_v34, 0  ;;  %v2082_v32 = vld [vmem:[%s2320_s1 + $0x10] sm:$0xff]   ;;  %v1874_v34 = vld [vmem:[%s2575_s22] ss:$0 sm:$0xff] }
 0x414   : > { %1969 = vmatpush3.bf16.msra.mxu0 %v1129_v33  ;;  %v1071_v35 = vpack.c.bf16 %v1067_v31, %v1067_v31  ;;  %v2083_v33 = vld [vmem:[%s2320_s1 + $0x18] sm:$0xff]  }
 0x415   : > { %v2097_v36 = vpop.eup %2096  ;;  %1980 = vmatprep.subr.bf16.mxu0 %v2150_v2 }
 0x416   : > { %v1068_v37 = vmul.f32 %v2097_v36, %v2089_v19  ;;  %v2081_v19 = vld [vmem:[%s2320_s1 + $0x8] sm:$0xff]  }
 0x417   : > { %1971 = vmatmul.mubr.msk.bf16.vlgmr.msra.gmra.mrb[12].mxu0 %vm832_vm3, %v1071_v35 }
 0x418   : > { %1981 = vmatpush3.bf16.msra.mxu0 %v1225_v38  ;;  %v1072_v39 = vpack.c.bf16 %v1068_v37, %v1068_v37  ;;  %1982 = vmatprep.mubr.msk.bf16.mxu0 %vm2151_vm1, %v2150_v2 }
 0x419   : > { %v2099_v40 = vpop.eup %2098  ;;  %1994 = vmatprep.subr.bf16.mxu0 %v2150_v2 }
 0x41a   : > { %v1069_v41 = vmul.f32 %v2099_v40, %v2091_v22  ;;  %1977 = vmatmul.mubr.msk.bf16.vlgmr.msra.gmra.mrb[12].mxu1 %vm832_vm3, %v1072_v39 }
 0x41b   : > { %1990 = vmatprep.mubr.msk.bf16.mxu1 %vm2151_vm1, %v2150_v2  ;;  %1987 = vmatpush3.bf16.msra.mxu1 %v2076_v47 }
 0x41c   : > { %v1073_v42 = vpack.c.bf16 %v1069_v41, %v1069_v41  ;;  %1988 = vmatprep.subr.bf16.mxu1 %v2150_v2 }
 0x41f   : > { %1983 = vmatmul.mubr.msk.bf16.vlgmr.msra.gmra.mrb[16].mxu0 %vm832_vm3, %v1073_v42  ;;  %1989 = vmatpush3.bf16.msra.mxu1 %v2077_v48 }
 0x420   : > { %1998 = vmatprep.mubr.msk.bf16.mxu0 %vm2151_vm1, %v2150_v2  ;;  %2002 = vmatprep.subr.bf16.mxu1 %v2150_v2 }
 0x421   : > { %1995 = vmatpush3.bf16.msra.mxu0 %v2078_v14 }
 0x422   : > { %1996 = vmatprep.subr.bf16.mxu0 %v2150_v2 }
 0x425   : > { %1997 = vmatpush3.bf16.msra.mxu0 %v2079_v15 }
 0x480   : > { %v1117_v43 = vpop.f32.mrb[8].mxu1 }
 0x481   : > { %1267 = vst.msk [vmem:[#allocation3] sm:$0xff] %vm832_vm3, %v1117_v43  ;;  %v1966_v44 = vpop.f32.mrb[9].mxu1 }
 0x482   : > { %v1120_v45 = vpop.f32.mrb[10].mxu1 }
 0x483   : > { %v1967_v46 = vpop.f32.mrb[11].mxu1 }
 0x4ea   : > { %v1165_v49 = vpop.f32.mrb[12].mxu0 }
 0x4eb   : > { %1269 = vrot.lane.b32.xlu0 %v1165_v49, %s2157_s25  ;;  %v1972_v50 = vpop.f32.mrb[13].mxu0 }
 0x4ec   : > { %v1168_v51 = vpop.f32.mrb[14].mxu0 }
 0x4ed   : > { %v1973_v52 = vpop.f32.mrb[15].mxu0  ;;  %v1213_v53 = vpop.f32.mrb[12].mxu1 }
 0x4ee   : > { %1275 = vrot.lane.b32.xlu1 %v1213_v53, %s2158_s4  ;;  %v1978_v54 = vpop.f32.mrb[13].mxu1  ;;  %s2577_s4 = sld [smem:[#allocation4_spill]] }
 0x4ef   : > { %v1216_v55 = vpop.f32.mrb[14].mxu1 }
 0x4f0   : > { %v1979_v56 = vpop.f32.mrb[15].mxu1 }
 0x4f2   : > { %v1261_v57 = vpop.f32.mrb[16].mxu0 }
 0x4f3   : > { %1281 = vrot.lane.b32.xlu0 %v1261_v57, %s2159_s23  ;;  %v1984_v58 = vpop.f32.mrb[17].mxu0 }
 0x4f4   : > { %v1264_v59 = vpop.f32.mrb[18].mxu0  ;;  %p1886_p8 = scmp.ne.s32.totalorder %s2577_s4, 1 }
 0x4f5   : > { %v1985_v60 = vpop.f32.mrb[19].mxu0  ;;  %s2578_s8 = sld [smem:[#allocation17_spill]] (!%p1886_p8)  ;;  %vm2161_vm9 = vmmov (!%p1886_p8), 0   ;;  %s2579_s17 = sld [smem:[#allocation18_spill]] (!%p1886_p8)  ;;  %vm1643_vm10 = vcmask (!%p1886_p8), 15360  }
 0x4f6   : > { %v1884_v60 = vld [vmem:[%s713_s2] ss:$0 sm:$0xff] }
 0x55d   : > { %v1270_v61 = vpop.permute.xlu0 %1269 }
 0x55e   : > { %1273 = vst.msk [vmem:[#allocation3] sm:$0xff] %vm1272_vm5, %v1270_v61 }
 0x560   : > { %v1276_v62 = vpop.permute.xlu1 %1275 }
 0x561   : > { %1279 = vst.msk [vmem:[#allocation3] sm:$0xff] %vm1278_vm6, %v1276_v62  ;;  %v1885_v62 = vld [vmem:[%s716_s24] ss:$0 sm:$0xff] }
 0x565   : > { %v1282_v63 = vpop.permute.xlu0 %1281 }
 0x566   : > { %1285 = vst.msk [vmem:[#allocation3] sm:$0xff] %vm1284_vm7, %v1282_v63 }
 0x56d   : > { %v1286_v0 = vld [vmem:[#allocation3] sm:$0xff] }
 0x56e   : > { %v1287_v1 = vpack.c.bf16 %v1286_v0, %v1286_v0 }
 0x570   : > { %1991 = vmatmul.mubr.msk.bf16.vlgmr.msra.gmra.mrb[16].mxu1 %vm754_vm2, %v1287_v1  ;;  %v2104_v1 = vld [vmem:[%s2578_s8] sm:$0xff] (!%p1886_p8)  }
 0x571   : > { %2010 = vmatprep.mubr.msk.bf16.mxu1 %vm2151_vm1, %v2150_v2  ;;  %2003 = vmatpush3.bf16.msra.mxu1 %v2080_v18 }
 0x572   : > { %2004 = vmatprep.subr.bf16.mxu1 %v2150_v2 }
 0x575   : > { %2005 = vmatpush3.bf16.msra.mxu1 %v2081_v19 }
 0x576   : > { %2006 = vmatprep.subr.bf16.mxu1 %v2150_v2 }
 0x579   : > { %2007 = vmatpush3.bf16.msra.mxu1 %v2082_v32 }
 0x57a   : > { %2008 = vmatprep.subr.bf16.mxu1 %v2150_v2  ;;  %v1878_v2 = vld [vmem:[%s2576_s0] ss:$0 sm:$0xff] }
 0x57d   : > { %2009 = vmatpush3.bf16.msra.mxu1 %v2083_v33 }
 0x643   : > { %v1348_v5 = vpop.f32.mrb[16].mxu1 }
 0x644   : > { %v1349_v6 = vadd.f32 %v1868_v3, %v1348_v5  ;;  %v1992_v7 = vpop.f32.mrb[17].mxu1  ;;  %v2160_v3 = vmov (!%p1886_p8), 0.0   ;;  %v2105_v5 = vld [vmem:[%s2578_s8 + $0x8] sm:$0xff] (!%p1886_p8)  }
 0x645   : > { %v1351_v8 = vpop.f32.mrb[18].mxu1  ;;  %2014 = vmatprep.subr.bf16.mxu0 (!%p1886_p8), %v2160_v3  ;;  %v1887_v7 = vld [vmem:[%s2579_s17] ss:$0 sm:$0xff] (!%p1886_p8) }
 0x646   : > { %v1354_v9 = vadd.f32 %v1349_v6, %v2348_v4  ;;  %v1993_v10 = vpop.f32.mrb[19].mxu1 }
 0x648   : > { %v1357_v11 = vsel %vm754_vm2, %v1354_v9, 0.0  ;;  %v1362_v12 = vmul.f32 %v1354_v9, %v1354_v9 }
 0x649   : > { %1358 = vadd.xlane.f32.xlu1 %v1357_v11 }
 0x64a   : > { %v1363_v13 = vsel %vm754_vm2, %v1362_v12, 0.0 }
 0x64b   : > { %1364 = vadd.xlane.f32.xlu0 %v1363_v13 }
 0x6d6   : > { %v1359_v4 = vpop.xlane.xlu1 %1358 }
 0x6d7   : > { %v1361_v21 = vmul.f32 0.03125, %v1359_v4 }
 0x6d8   : > { %v1365_v22 = vpop.xlane.xlu0 %1364 }
 0x6d9   : > { %v1367_v23 = vmul.f32 %v1361_v21, %v1361_v21  ;;  %v1366_v24 = vmul.f32 0.03125, %v1365_v22  ;;  %v1369_v27 = vsub.f32 %v1354_v9, %v1361_v21 }
 0x6db   : > { %v1368_v25 = vsub.f32 %v1366_v24, %v1367_v23 }
 0x6dd   : > { %v1370_v26 = vadd.f32 1e-05, %v1368_v25 }
 0x6df   : > { %2100 = vrsqrt.f32 %v1370_v26 }
 0x6e9   : > { %v2101_v28 = vpop.eup %2100 }
 0x6ea   : > { %v1372_v20 = vmul.f32 %v2101_v28, %v1369_v27 }
 0x6ec   : > { %v1379_v16 = vmul.f32 %v1872_v29, %v1372_v20 }
 0x6ee   : > { %v1386_v17 = vadd.f32 %v1873_v30, %v1379_v16 }
 0x6f0   : > { %v1387_v31 = vpack.c.bf16 %v1386_v17, %v1386_v17 }
 0x6f2   : > { %1999 = vmatmul.mubr.msk.bf16.vlgmr.msra.gmra.mrb[20].mxu0 %vm754_vm2, %v1387_v31 }
 0x6f3   : > { %2015 = vmatpush3.bf16.msra.mxu0 (!%p1886_p8), %v2104_v1  ;;  %2018 = vmatprep.mubr.msk.bf16.mxu0 (!%p1886_p8), %vm2161_vm9, %v2160_v3 }
 0x6f4   : > { %2016 = vmatprep.subr.bf16.mxu0 (!%p1886_p8), %v2160_v3 }
 0x6f7   : > { %2017 = vmatpush3.bf16.msra.mxu0 (!%p1886_p8), %v2105_v5 }
 0x7c5   : > { %v1448_v35 = vpop.f32.mrb[20].mxu0 }
 0x7c6   : > { %v1449_v36 = vadd.f32 %v1874_v34, %v1448_v35  ;;  %v2000_v37 = vpop.f32.mrb[21].mxu0 }
 0x7c7   : > { %v1451_v38 = vpop.f32.mrb[22].mxu0 }
 0x7c8   : > { %v1454_v39 = vmax.f32 %v1449_v36, 0.0  ;;  %v2001_v40 = vpop.f32.mrb[23].mxu0 }
 0x7ca   : > { %v1455_v41 = vpack.c.bf16 %v1454_v39, %v1454_v39 }
 0x7cc   : > { %2011 = vmatmul.mubr.msk.bf16.vlgmr.msra.gmra.mrb[20].mxu1 %vm1495_vm8, %v1455_v41 }
 0x89f   : > { %v1533_v42 = vpop.f32.mrb[20].mxu1 }
 0x8a0   : > { %v1534_v43 = vadd.f32 %v1878_v2, %v1533_v42  ;;  %v2012_v44 = vpop.f32.mrb[21].mxu1 }
 0x8a1   : > { %v1536_v45 = vpop.f32.mrb[22].mxu1 }
 0x8a2   : > { %v1539_v46 = vadd.f32 %v1534_v43, %v1386_v17  ;;  %v2013_v47 = vpop.f32.mrb[23].mxu1 }
 0x8a4   : > { %v1542_v48 = vsel %vm754_vm2, %v1539_v46, 0.0  ;;  %v1546_v49 = vmul.f32 %v1539_v46, %v1539_v46 }
 0x8a5   : > { %1543 = vadd.xlane.f32.xlu0 %v1542_v48 }
 0x8a6   : > { %v1547_v50 = vsel %vm754_vm2, %v1546_v49, 0.0 }
 0x8a7   : > { %1548 = vadd.xlane.f32.xlu1 %v1547_v50 }
 0x932   : > { %v1544_v51 = vpop.xlane.xlu0 %1543 }
 0x933   : > { %v1545_v52 = vmul.f32 0.03125, %v1544_v51 }
 0x934   : > { %v1549_v53 = vpop.xlane.xlu1 %1548 }
 0x935   : > { %v1551_v54 = vmul.f32 %v1545_v52, %v1545_v52  ;;  %v1550_v55 = vmul.f32 0.03125, %v1549_v53  ;;  %v1553_v58 = vsub.f32 %v1539_v46, %v1545_v52 }
 0x937   : > { %v1552_v56 = vsub.f32 %v1550_v55, %v1551_v54 }
 0x939   : > { %v1554_v57 = vadd.f32 1e-05, %v1552_v56 }
 0x93b   : > { %2102 = vrsqrt.f32 %v1554_v57 }
 0x945   : > { %v2103_v59 = vpop.eup %2102 }
 0x946   : > { %v1556_v61 = vmul.f32 %v2103_v59, %v1553_v58  ;;  %1575 = sbr.rel (%p1886_p8) target bundleno = 2911 (0xb5f), region = 92 }
 0x948   : > { %v1563_v63 = vmul.f32 %v1884_v60, %v1556_v61 }
 0x94a   : > { %v1570_v0 = vadd.f32 %v1885_v62, %v1563_v63 }
 0x94c   : > { %1571 = vst.msk [vmem:[#allocation2] sm:$0xff] %vm754_vm2, %v1570_v0  ;;  %v1576_v6 = vpack.c.bf16 (!%p1886_p8), %v1570_v0, %v1570_v0 }
 0x94e   : > { %2019 = vmatmul.mubr.msk.bf16.vlgmr.msra.gmra.mrb[0].mxu0 %vm754_vm2, %v1576_v6 }
 0xa21   : > { %v1637_v8 = vpop.f32.mrb[0].mxu0 }
 0xa22   : > { %v1638_v9 = vadd.f32 %v1887_v7, %v1637_v8  ;;  %v2020_v10 = vpop.f32.mrb[1].mxu0 }
 0xa23   : > { %v1640_v11 = vpop.f32.mrb[2].mxu0 }
 0xa24   : > { %v2021_v12 = vpop.f32.mrb[3].mxu0  ;;  %v1644_v13 = vsel %vm1643_vm10, %v1638_v9, -inf }
 0xa25   : > { %1645 = vmax.xlane.f32.xlu0 %v1644_v13 }
 0xab2   : > { %v1646_v14 = vpop.xlane.xlu0 %1645 }
 0xab3   : > { %v1647_v15 = vsub.f32 %v1638_v9, %v1646_v14 }
 0xab5   : > { %v1648_v18 = vmul.f32 1.442695, %v1647_v15 }
 0xab7   : > { %2106 = vpow2.f32 %v1648_v18 }
 0xac1   : > { %v2107_v19 = vpop.eup %2106 }
 0xac2   : > { %v1650_v4 = vsel %vm1643_vm10, %v2107_v19, 0.0 }
 0xac3   : > { %1651 = vadd.xlane.f32.xlu0 %v1650_v4 }
 0xb50   : > { %v1652_v21 = vpop.xlane.xlu0 %1651 }
 0xb51   : > { %2108 = vrcp.f32 %v1652_v21 }
 0xb5b   : > { %v2109_v22 = vpop.eup %2108 }
 0xb5c   : > { %v1654_v23 = vmul.f32 %v2109_v22, %v2107_v19 }
 0xb5e   : > { %1655 = vst.msk [vmem:[%s2341_s15] sm:$0xff] %vm1643_vm10, %v1654_v23 }
 0xb5f PF: > { %s2580_s29 = sld [smem:[#allocation7_spill]]  ;;  %s2581_s21 = sld [smem:[#allocation5_spill]] }
 0xb60   : > { %s2582_s22 = sld [smem:[#allocation6_spill]]  ;;  %s2583_s23 = sld [smem:[#allocation8_spill]] }
 0xb61   : > { %s2584_s24 = sld [smem:[#allocation9_spill]] }
 0xb65   : > { %s26_s25 = sadd.s32 1, %s2580_s29  }
 0xb66   : > { %p23_p9 = scmp.ge.s32.totalorder %s26_s25, 6  }
 0xb68   :  { %25 = sbr.rel (!%p23_p9) target bundleno = 10 (0xa), region = 158 }

</bundles_post_ra>
